<compile_context>
chip_gen: v6e
topology: v6e:2x2x1
jax: 0.10.0
libtpu: 0.0.40
codegen_flags: <defaults>
</compile_context>

<pallas_src>
import functools

import jax
import jax.numpy as jnp
from jax import lax
from jax.experimental import pallas as pl
from jax.experimental.pallas import tpu as pltpu


def _pool_kernel(tok_ref, mask_ref, out_ref, cnt_ref, *,
                 seq_len, ts, ragged, normalize_in_kernel):
    """Masked mean pooling over sequence tiles (+ optional L2 normalize).

    tok_ref : [TB, TS, TH]  native dtype (bf16-friendly)
    mask_ref: [TB, TS]      same dtype as tok, exact 0/1 values
    out_ref : [TB, TH]      f32 — used directly as the resident accumulator
    cnt_ref : [TB, 1]       f32 scratch — running sum(mask) over S tiles
    """
    s = pl.program_id(2)
    n_s = pl.num_programs(2)

    @pl.when(s == 0)
    def _init():
        out_ref[...] = jnp.zeros_like(out_ref)
        cnt_ref[...] = jnp.zeros_like(cnt_ref)

    tok = tok_ref[...]       # (TB, TS, TH)
    mask = mask_ref[...]     # (TB, TS)

    def accumulate(m, t):
        # Batched [1,TS] x [TS,TH] contraction per batch row on the MXU with
        # f32 accumulation (same batched-dot pattern as flash attention).
        # mask is exact 0/1, so bf16 x bf16 + f32 accumulate is exact.
        contrib = lax.dot_general(
            m[:, None, :], t,
            dimension_numbers=(((2,), (1,)), ((0,), (0,))),
            preferred_element_type=jnp.float32)          # (TB, 1, TH)
        out_ref[...] += contrib[:, 0, :]
        cnt_ref[...] += jnp.sum(m.astype(jnp.float32), axis=1, keepdims=True)

    if ragged:
        # The last S tile extends past seq_len; those rows of tok/mask are
        # undefined (OOB block read), so zero them before they can touch the
        # accumulators.  Only the last tile pays for the select.
        @pl.when(s != n_s - 1)
        def _full_tile():
            accumulate(mask, tok)

        @pl.when(s == n_s - 1)
        def _tail_tile():
            base = s * ts
            tb, ts_, _ = tok.shape
            valid2 = (lax.broadcasted_iota(jnp.int32, (tb, ts_), 1) + base) < seq_len
            valid3 = (lax.broadcasted_iota(jnp.int32, (tb, ts_, 1), 1) + base) < seq_len
            accumulate(jnp.where(valid2, mask, jnp.zeros_like(mask)),
                       jnp.where(valid3, tok, jnp.zeros_like(tok)))
    else:
        accumulate(mask, tok)

    @pl.when(s == n_s - 1)
    def _finalize():
        counts = jnp.maximum(cnt_ref[...], 1e-9)         # torch.clamp(min=1e-9)
        if normalize_in_kernel:
            # approx EUP reciprocal is safe: the same factor multiplies both
            # `pooled` and its norm, so it cancels exactly in the output.
            pooled = out_ref[...] * pl.reciprocal(counts, approx=True)
            sq = jnp.sum(pooled * pooled, axis=1, keepdims=True)
            # F.normalize(eps=1e-12): x / max(||x||, eps) == x*rsqrt(max(||x||^2, eps^2))
            out_ref[...] = pooled * lax.rsqrt(jnp.maximum(sq, 1e-24))
        else:
            out_ref[...] = out_ref[...] / counts


def _round_up(x, m):
    return ((x + m - 1) // m) * m


def _vmem_capacity_bytes():
    try:
        info = pltpu.get_tpu_info()
        cap = getattr(info, "vmem_capacity_bytes", None)
        if cap:
            return int(cap)
    except Exception:
        pass
    return 64 * 1024 * 1024        # conservative (v7x-class) fallback


def sentence_embedding(token_embeddings, attention_mask, normalize=True,
                       _force_tok_budget_bytes=None):
    """Pallas equivalent of AutoModelForSentenceEmbedding.forward, given the
    wrapped model's token embeddings (model_output[0]) and attention_mask."""
    B, S, H = token_embeddings.shape
    assert attention_mask.shape == (B, S)

    tok = token_embeddings                       # keep native dtype (bf16 ok)
    mask = attention_mask.astype(tok.dtype)      # exact 0/1 in the tok dtype
    itemsize = jnp.dtype(tok.dtype).itemsize

    # ---- generation-aware VMEM budgets ------------------------------------
    big_vmem = _vmem_capacity_bytes() >= 96 * 1024 * 1024   # v5e/v6e: 128 MiB
    tok_budget = (24 if big_vmem else 10) * 1024 * 1024     # per tok buffer
    vmem_limit = (96 if big_vmem else 48) * 1024 * 1024
    if _force_tok_budget_bytes is not None:                  # test hook
        tok_budget = _force_tok_budget_bytes

    # ---- batch tiling: avoid batch padding ---------------------------------
    tb_cap = max(8, min(128, (tok_budget // (128 * H * itemsize)) // 8 * 8))
    if B <= tb_cap:
        TB, n_b = B, 1           # a full-B block is legal for any B
    else:
        n_b = pl.cdiv(B, tb_cap)
        TB = _round_up(pl.cdiv(B, n_b), 8)
        n_b = pl.cdiv(B, TB)     # ragged batch tail handled by OOB semantics

    # ---- hidden tiling: only to keep both v7x TensorCores busy -------------
    num128 = H // 128
    if n_b >= 2 or H % 128 != 0 or num128 < 2:
        n_h, TH = 1, H
    else:
        n_h = 2 if num128 % 2 == 0 else num128
        TH = H // n_h
    normalize_in_kernel = normalize and (n_h == 1)

    # ---- sequence tiling: balanced -> minimal ragged tail, no jnp.pad ------
    row_bytes = TB * TH * itemsize
    if S * row_bytes <= tok_budget:
        TS, n_s = S, 1
    else:
        ts_cap = max(128, (tok_budget // row_bytes) // 128 * 128)
        n_s = pl.cdiv(S, ts_cap)
        TS = _round_up(pl.cdiv(S, n_s), 128)   # multiple of 128 for the 2-D mask
        n_s = pl.cdiv(S, TS)
    ragged = (n_s * TS != S)

    grid = (n_b, n_h, n_s)

    kernel = functools.partial(
        _pool_kernel, seq_len=S, ts=TS, ragged=ragged,
        normalize_in_kernel=normalize_in_kernel)

    cost = pl.CostEstimate(
        flops=2 * B * S * H + 4 * B * H,
        transcendentals=2 * B,
        bytes_accessed=B * S * H * itemsize + B * S * itemsize + B * H * 4,
    )

    out = pl.pallas_call(
        kernel,
        out_shape=jax.ShapeDtypeStruct((B, H), jnp.float32),
        grid_spec=pltpu.PrefetchScalarGridSpec(
            num_scalar_prefetch=0,
            grid=grid,
            in_specs=[
                # TODO(synk): if profiles show exposed DMA at small TS, add
                # pipeline_mode=pl.Buffered(3) to the token-embedding spec.
                pl.BlockSpec((TB, TS, TH), lambda b, h, s: (b, s, h)),
                pl.BlockSpec((TB, TS), lambda b, h, s: (b, s)),
            ],
            # Same output block for every s step => resident f32 accumulator.
            out_specs=pl.BlockSpec((TB, TH), lambda b, h, s: (b, h)),
            scratch_shapes=[pltpu.VMEM((TB, 1), jnp.float32)],
        ),
        compiler_params=pltpu.CompilerParams(
            dimension_semantics=("parallel", "parallel", "arbitrary"),
            vmem_limit_bytes=vmem_limit,
        ),
        cost_estimate=cost,
    )(tok, mask)

    if normalize and not normalize_in_kernel:
        # H was tiled across a parallel grid axis; the (cheap) L2 normalize
        # over the full hidden dim runs on the tiny pooled result instead.
        nrm = jnp.sqrt(jnp.sum(out * out, axis=1, keepdims=True))
        out = out / jnp.maximum(nrm, 1e-12)
    return out


def reference(token_embeddings, attention_mask, normalize=True):
    """Pure-JAX reference mirroring the PyTorch forward."""
    tok = token_embeddings.astype(jnp.float32)
    m = attention_mask.astype(jnp.float32)[:, :, None]
    pooled = jnp.sum(tok * m, axis=1) / jnp.maximum(jnp.sum(m, axis=1), 1e-9)
    if normalize:
        nrm = jnp.maximum(jnp.linalg.norm(pooled, axis=1, keepdims=True), 1e-12)
        pooled = pooled / nrm
    return pooled


if __name__ == "__main__":
    key = jax.random.PRNGKey(0)
    k1, k2, k3 = jax.random.split(key, 3)

    # --- Test 1: tiny shapes consistent with the module (B=2, S=8, H=32) ----
    B, S, H = 2, 8, 32
    tok = jax.random.normal(k1, (B, S, H), dtype=jnp.float32)
    lengths = jnp.array([S, S // 2], dtype=jnp.int32)
    mask = (jnp.arange(S)[None, :] < lengths[:, None]).astype(jnp.float32)
    out = jax.block_until_ready(sentence_embedding(tok, mask, normalize=True))
    ref = reference(tok, mask, normalize=True)
    assert out.shape == (B, H)
    assert jnp.allclose(out, ref, atol=1e-5, rtol=1e-5), "mismatch vs reference (f32)"

    # --- Test 2: bf16, forced small budget -> batch tiling with ragged batch
    #     tail and 128-multiple S tiles with an in-kernel ragged last tile.
    B2, S2, H2 = 10, 300, 256
    tok2 = jax.random.normal(k2, (B2, S2, H2), dtype=jnp.float32).astype(jnp.bfloat16)
    lengths2 = (jnp.arange(B2, dtype=jnp.int32) * 67) % S2 + 1
    mask2 = (jnp.arange(S2)[None, :] < lengths2[:, None]).astype(jnp.float32)
    out2 = jax.block_until_ready(
        sentence_embedding(tok2, mask2, normalize=True,
                           _force_tok_budget_bytes=128 * 1024))
    ref2 = reference(tok2, mask2, normalize=True)
    assert out2.shape == (B2, H2)
    assert jnp.allclose(out2, ref2, atol=1e-4, rtol=1e-4), "mismatch vs reference (bf16)"

    # --- Test 3: single batch tile -> hidden dim split across a parallel axis
    #     (L2 normalize applied to the pooled result outside the kernel).
    B3, S3, H3 = 2, 40, 256
    tok3 = jax.random.normal(k3, (B3, S3, H3), dtype=jnp.float32)
    lengths3 = jnp.array([S3, 7], dtype=jnp.int32)
    mask3 = (jnp.arange(S3)[None, :] < lengths3[:, None]).astype(jnp.float32)
    out3 = jax.block_until_ready(sentence_embedding(tok3, mask3, normalize=True))
    ref3 = reference(tok3, mask3, normalize=True)
    assert out3.shape == (B3, H3)
    assert jnp.allclose(out3, ref3, atol=1e-5, rtol=1e-5), "mismatch vs reference (H-split)"

    print("KERNEL_OK")
</pallas_src>

<mosaic_0001>
module attributes {stable_mosaic.version = 11 : i64} {
  func.func @_pool_kernel(%arg0: i32, %arg1: i32, %arg2: i32, %arg3: memref<2x8x32xf32, #tpu.memory_space<vmem>>, %arg4: memref<2x8xf32, #tpu.memory_space<vmem>>, %arg5: memref<2x32xf32, #tpu.memory_space<vmem>>, %arg6: memref<2x1xf32, #tpu.memory_space<vmem>>) attributes {dimension_semantics = [#tpu.dimension_semantics<parallel>, #tpu.dimension_semantics<parallel>, #tpu.dimension_semantics<arbitrary>], iteration_bounds = array<i64: 1, 1, 1>, scalar_prefetch = 0 : i64, scratch_operands = 1 : i64, tpu.core_type = #tpu.core_type<tc>, window_params = [{transform_indices = @transform_0, window_bounds = array<i64: 2, 8, 32>}, {transform_indices = @transform_1, window_bounds = array<i64: 2, 8>}, {transform_indices = @transform_2, window_bounds = array<i64: 2, 32>}]} {
    %c0_i32 = arith.constant 0 : i32
    %0 = arith.cmpi eq, %arg2, %c0_i32 : i32
    %1 = arith.extui %0 : i1 to i32
    %c0_i32_0 = arith.constant 0 : i32
    %2 = arith.cmpi ne, %1, %c0_i32_0 : i32
    scf.if %2 {
      %cst_16 = arith.constant 0.000000e+00 : f32
      %19 = vector.broadcast %cst_16 : f32 to vector<2x32xf32>
      %c0_17 = arith.constant 0 : index
      %c0_18 = arith.constant 0 : index
      %20 = vector.load %arg5[%c0_17, %c0_18] : memref<2x32xf32, #tpu.memory_space<vmem>>, vector<2x32xf32>
      tpu.vector_store %arg5[%c0_17, %c0_18], %19 {strides = array<i32>} : memref<2x32xf32, #tpu.memory_space<vmem>>, vector<2x32xf32>,
      %cst_19 = arith.constant 0.000000e+00 : f32
      %21 = vector.broadcast %cst_19 : f32 to vector<2x1xf32>
      %c0_20 = arith.constant 0 : index
      %c0_21 = arith.constant 0 : index
      %22 = vector.load %arg6[%c0_20, %c0_21] : memref<2x1xf32, #tpu.memory_space<vmem>>, vector<2x1xf32>
      tpu.vector_store %arg6[%c0_20, %c0_21], %21 {strides = array<i32>} : memref<2x1xf32, #tpu.memory_space<vmem>>, vector<2x1xf32>,
    } else {
    }
    %c0 = arith.constant 0 : index
    %c0_1 = arith.constant 0 : index
    %c0_2 = arith.constant 0 : index
    %3 = vector.load %arg3[%c0, %c0_1, %c0_2] : memref<2x8x32xf32, #tpu.memory_space<vmem>>, vector<2x8x32xf32>
    %c0_3 = arith.constant 0 : index
    %c0_4 = arith.constant 0 : index
    %4 = vector.load %arg4[%c0_3, %c0_4] : memref<2x8xf32, #tpu.memory_space<vmem>>, vector<2x8xf32>
    %5 = vector.shape_cast %4 : vector<2x8xf32> to vector<2x1x8xf32>
    %cst = arith.constant dense<0.000000e+00> : vector<2x1x32xf32>
    %6 = tpu.matmul %5, %3, %cst {dimension_numbers = #tpu.dot_dimension_numbers<[2], [1], [1], [2], [0, 0, 0, 1, 1, 2], [0], [0]>} : vector<2x1x8xf32>, vector<2x8x32xf32>, vector<2x1x32xf32> -> vector<2x1x32xf32>
    %c0_5 = arith.constant 0 : index
    %c0_6 = arith.constant 0 : index
    %7 = vector.load %arg5[%c0_5, %c0_6] : memref<2x32xf32, #tpu.memory_space<vmem>>, vector<2x32xf32>
    %8 = vector.shape_cast %6 : vector<2x1x32xf32> to vector<2x32xf32>
    %9 = arith.addf %7, %8 : vector<2x32xf32>
    %c0_7 = arith.constant 0 : index
    %c0_8 = arith.constant 0 : index
    %10 = vector.load %arg5[%c0_7, %c0_8] : memref<2x32xf32, #tpu.memory_space<vmem>>, vector<2x32xf32>
    tpu.vector_store %arg5[%c0_7, %c0_8], %9 {strides = array<i32>} : memref<2x32xf32, #tpu.memory_space<vmem>>, vector<2x32xf32>,
    %c0_9 = arith.constant 0 : index
    %c0_10 = arith.constant 0 : index
    %11 = vector.load %arg6[%c0_9, %c0_10] : memref<2x1xf32, #tpu.memory_space<vmem>>, vector<2x1xf32>
    %cst_11 = arith.constant dense<0.000000e+00> : vector<2xf32>
    %12 = vector.multi_reduction <add>, %4, %cst_11 [1] : vector<2x8xf32> to vector<2xf32>
    %13 = vector.shape_cast %12 : vector<2xf32> to vector<2x1xf32>
    %14 = arith.addf %11, %13 : vector<2x1xf32>
    %c0_12 = arith.constant 0 : index
    %c0_13 = arith.constant 0 : index
    %15 = vector.load %arg6[%c0_12, %c0_13] : memref<2x1xf32, #tpu.memory_space<vmem>>, vector<2x1xf32>
    tpu.vector_store %arg6[%c0_12, %c0_13], %14 {strides = array<i32>} : memref<2x1xf32, #tpu.memory_space<vmem>>, vector<2x1xf32>,
    %c0_i32_14 = arith.constant 0 : i32
    %16 = arith.cmpi eq, %arg2, %c0_i32_14 : i32
    %17 = arith.extui %16 : i1 to i32
    %c0_i32_15 = arith.constant 0 : i32
    %18 = arith.cmpi ne, %17, %c0_i32_15 : i32
    scf.if %18 {
      %c0_16 = arith.constant 0 : index
      %c0_17 = arith.constant 0 : index
      %19 = vector.load %arg6[%c0_16, %c0_17] : memref<2x1xf32, #tpu.memory_space<vmem>>, vector<2x1xf32>
      %cst_18 = arith.constant 9.99999971E-10 : f32
      %20 = vector.broadcast %cst_18 : f32 to vector<2x1xf32>
      %21 = arith.maximumf %19, %20 : vector<2x1xf32>
      %c0_19 = arith.constant 0 : index
      %c0_20 = arith.constant 0 : index
      %22 = vector.load %arg5[%c0_19, %c0_20] : memref<2x32xf32, #tpu.memory_space<vmem>>, vector<2x32xf32>
      %23 = tpu.reciprocal %21 {approx = true} : vector<2x1xf32> -> vector<2x1xf32>
      %24 = vector.broadcast %23 : vector<2x1xf32> to vector<2x32xf32>
      %25 = arith.mulf %22, %24 : vector<2x32xf32>
      %26 = arith.mulf %25, %25 : vector<2x32xf32>
      %cst_21 = arith.constant dense<0.000000e+00> : vector<2xf32>
      %27 = vector.multi_reduction <add>, %26, %cst_21 [1] : vector<2x32xf32> to vector<2xf32>
      %28 = vector.shape_cast %27 : vector<2xf32> to vector<2x1xf32>
      %cst_22 = arith.constant 1.000000e-24 : f32
      %29 = vector.broadcast %cst_22 : f32 to vector<2x1xf32>
      %30 = arith.maximumf %28, %29 : vector<2x1xf32>
      %31 = math.rsqrt %30 : vector<2x1xf32>
      %32 = vector.broadcast %31 : vector<2x1xf32> to vector<2x32xf32>
      %33 = arith.mulf %25, %32 : vector<2x32xf32>
      %c0_23 = arith.constant 0 : index
      %c0_24 = arith.constant 0 : index
      %34 = vector.load %arg5[%c0_23, %c0_24] : memref<2x32xf32, #tpu.memory_space<vmem>>, vector<2x32xf32>
      tpu.vector_store %arg5[%c0_23, %c0_24], %33 {strides = array<i32>} : memref<2x32xf32, #tpu.memory_space<vmem>>, vector<2x32xf32>,
    } else {
    }
    return
  }
  func.func @transform_0(%arg0: i32, %arg1: i32, %arg2: i32) -> (i32, i32, i32) {
    %c0_i32 = arith.constant 0 : i32
    return %arg0, %arg2, %arg1 : i32, i32, i32
  }
  func.func @transform_1(%arg0: i32, %arg1: i32, %arg2: i32) -> (i32, i32) {
    %c0_i32 = arith.constant 0 : i32
    return %arg0, %arg2 : i32, i32
  }
  func.func @transform_2(%arg0: i32, %arg1: i32, %arg2: i32) -> (i32, i32) {
    %c0_i32 = arith.constant 0 : i32
    return %arg0, %arg1 : i32, i32
  }
}

</mosaic_0001>

<bundles_post_ra>
// kernel: tpu_custom_call.1
= control target key start
LH: loop header
LB: loop body
LE: loop exit
PB: predicated region body
PF: predicated region fallthrough
CT: control target
= control target key end

     0   :  { %7 = vsyncpa [#allocation4], 0  ;;  %s407_s0 = inlined_call_operand.hbm [shape: f32[2,8,32], index: 0, kind: input, shape index: {}]   ;;  %s408_s1 = inlined_call_operand.hbm [shape: f32[2,8], index: 1, kind: input, shape index: {}]   ;;  %s409_s2 = inlined_call_operand.hbm [shape: f32[2,32], index: 2, kind: output, shape index: {}]  }
   0x1   :  { %8 = vsyncpa [#allocation7], 0 }
   0x2   :  { %9 = vsyncpa [#allocation5], 0  ;;  %s368_s9 = smov [#allocation3]  }
   0x3   :  { %s15_s10 = sshll.u32 %s368_s9, 4  ;;  %s16_s10 = int_to_ptr.vmem [resolvable:$true] %s15_s10 }
   0x4   :  { %s310_s11 = scalar_lea.vmem %s16_s10, 256  ;;  %p315_p1 = scmp.lt.s32.totalorder %s16_s10, %s16_s10 }
   0x5   :  { %p311_p0 = scmp.ne.s32.totalorder %s16_s10, %s310_s11  ;;  %p316_p2 = scmp.lt.s32.totalorder %s310_s11, %s310_s11 }
   0x7   :  { %p317_p3 = por %p316_p2, %p315_p1 }
   0x9   :  { %p318_p4 = pnand %p317_p3, %p311_p0 }
   0xb   :  { %321 = shalt.err (!%p318_p4)
}
   0xc   :  { %s369_s12 = smov 128   ;;  %s370_s13 = smov 8  }
   0xd   :  { %21 = dma.hbm_to_vmem [thread:$0]  %s407_s0, 256, %s16_s10, [#allocation4], %s369_s12, %s369_s12, %s370_s13  }
   0xe   :  { %s371_s16 = smov [#allocation6]  }
   0xf   :  { %s28_s17 = sshll.u32 %s371_s16, 4  ;;  %s29_s17 = int_to_ptr.vmem [resolvable:$true] %s28_s17 }
  0x10   :  { %s330_s18 = scalar_lea.vmem %s29_s17, 32  ;;  %p335_p6 = scmp.lt.s32.totalorder %s29_s17, %s29_s17 }
  0x11   :  { %p331_p5 = scmp.ne.s32.totalorder %s29_s17, %s330_s18  ;;  %p336_p7 = scmp.lt.s32.totalorder %s330_s18, %s330_s18 }
  0x13   :  { %p337_p8 = por %p336_p7, %p335_p6 }
  0x15   :  { %p338_p9 = pnand %p337_p8, %p331_p5 }
  0x17   :  { %341 = shalt.err (!%p338_p9)
}
  0x18   :  { %31 = dma.hbm_to_vmem [thread:$0]  %s408_s1, 32, %s29_s17, [#allocation7]  }
  0x19   :  { %362 = dma.done.wait [#allocation4], 256  }
  0x1a   :  { %363 = vsyncadd [#allocation4], 4294967040 }
  0x1b   :  { %364 = dma.done.wait [#allocation7], 32  }
  0x1c   :  { %365 = vsyncadd [#allocation7], 4294967264  ;;  %v53_v0 = vlaneseq  ;;  %v372_v1 = vmov 1966171168   ;;  %v373_v3 = vmov 0.0   ;;  %vm44_vm0 = vcmask 1024  }
  0x1d   :  { %v51_v2 = vunpack.c.l.s4 %v372_v1  ;;  %283 = vmatprep.subr.mxu1 %v373_v3  ;;  %278 = vmatprep.subr.mxu0 %v373_v3  ;;  %vm374_vm1 = vmmov 0   ;;  %45 = vst.msk [vmem:[#allocation2] sm:$0x3] %vm44_vm0, %v373_v3  ;;  %vm228_vm2 = vcmask 58368   ;;  %v48_v7 = vld [vmem:[#allocation6] sm:$0x3] }
  0x1e   :  { %v54_v4 = vshrl.u32 %v53_v0, 7  ;;  %285 = vmatprep.mubr.msk.f32.mxu1 %vm374_vm1, %v373_v3  ;;  %280 = vmatprep.mubr.msk.f32.mxu0 %vm374_vm1, %v373_v3  ;;  %v47_v8 = vld [vmem:[#allocation3 + $0x8] sm:$0xff]  ;;  %v46_v9 = vld [vmem:[#allocation3] sm:$0xff]  ;;  %v229_v10 = vsel %vm228_vm2, %v48_v7, 0.0  ;;  %vm72_vm3 = vcmask 64512   ;;  %v375_v15 = vmov 0  }
  0x1f   :  { %v52_v5 = vunpack.c.0.s8 %v51_v2  ;;  %284 = vmatpush3.msra.mxu1 %v47_v8  ;;  %279 = vmatpush3.msra.mxu0 %v46_v9  ;;  %vm42_vm4 = vcmask 254976   ;;  %vm221_vm5 = vcmask 1041409   ;;  %s376_s0 = smov [#allocation8]  }
  0x20   :  { %230 = vadd.xlane.f32.xlu0 %v229_v10  ;;  %43 = vst.msk [vmem:[#allocation8] sm:$0x3] %vm42_vm4, %v373_v3  ;;  %s262_s1 = sshll.u32 %s376_s0, 4  ;;  %s263_s1 = int_to_ptr.vmem [resolvable:$true] %s262_s1 }
  0x21   :  { %v55_v6 = vsub.s32 %v52_v5, %v54_v4  ;;  %297 = vset.pattern.permute.xlu0 %v375_v15  ;;  %s342_s21 = scalar_lea.vmem %s263_s1, 32  ;;  %p347_p11 = scmp.lt.s32.totalorder %s263_s1, %s263_s1 }
  0x22   :  { %p343_p10 = scmp.ne.s32.totalorder %s263_s1, %s342_s21  ;;  %p348_p12 = scmp.lt.s32.totalorder %s342_s21, %s342_s21 }
  0x23   :  { %v56_v11 = vrot.slane %v48_v7, %v55_v6 }
  0x24   :  { %v227_v16 = vld [vmem:[#allocation2] sm:$0x3]  ;;  %p349_p13 = por %p348_p12, %p347_p11 }
  0x25   :  { %v57_v12 = vcombine.high %v56_v11, %v56_v11  ;;  %v64_v13 = vrot.slane %v56_v11, %v55_v6 }
  0x26   :  { %p350_p0 = pnand %p349_p13, %p343_p10 }
  0x27   :  { %v71_v14 = vrot.slane %v57_v12, %v55_v6  ;;  %281 = vmatmul.mubr.msk.f32.vlgmr.msra.gmra.mxu0 %vm72_vm3, %v64_v13  ;;  %v217_v26 = vld [vmem:[#allocation8] sm:$0x3] }
  0x29   :  { %286 = vmatmul.mubr.msk.f32.vlgmr.msra.gmra.mxu1 %vm72_vm3, %v71_v14 }
  0xa9   :  { %v231_v17 = vpop.xlane.xlu0 %230 }
  0xaa   :  { %v232_v18 = vadd.f32 %v231_v17, %v227_v16 }
  0xac   :  { %234 = vst.msk [vmem:[#allocation2] sm:$0x3] %vm44_vm0, %v232_v18 }
  0xb3   :  { %v238_v19 = vld [vmem:[#allocation2] sm:$0x3] }
  0xb4   :  { %v239_v20 = vmax.f32 %v238_v19, 1e-09 }
  0xb6   :  { %298 = vrcp.f32 %v239_v20 }
  0xc3   :  { %v299_v21 = vpop.eup %298 }
  0xc4   :  { %244 = vperm.xlu0 %297, %v299_v21  }
  0xe7   :  { %v141_v22 = vpop.f32.mrf.mxu0 }
  0xe9   :  { %v213_v23 = vpop.f32.mrf.mxu1  ;;  %v282_v24 = vpop.f32.mrf.mxu0 }
  0xea   :  { %v220_v25 = vrot.slane %v213_v23, 7 }
  0xeb   :  { %v287_v27 = vpop.f32.mrf.mxu1 }
  0xec   :  { %v222_v28 = vsel %vm221_vm5, %v220_v25, %v141_v22 }
  0xed   :  { %v224_v29 = vadd.f32 %v222_v28, %v217_v26 }
  0xef   :  { %226 = vst.msk [vmem:[#allocation8] sm:$0x3] %vm42_vm4, %v224_v29 }
  0xf6   :  { %v240_v30 = vld [vmem:[#allocation8] sm:$0x3] }
 0x13f   :  { %v245_v31 = vpop.permute.xlu0 %244 }
 0x140   :  { %v247_v32 = vmul.f32 %v245_v31, %v240_v30 }
 0x142   :  { %v248_v33 = vmul.f32 %v247_v32, %v247_v32 }
 0x144   :  { %v249_v34 = vsel %vm42_vm4, %v248_v33, 0.0 }
 0x145   :  { %250 = vadd.xlane.f32.xlu1 %v249_v34 }
 0x1ce   :  { %v251_v35 = vpop.xlane.xlu1 %250 }
 0x1cf   :  { %v252_v36 = vmax.f32 %v251_v35, 1e-24 }
 0x1d1   :  { %300 = vrsqrt.f32 %v252_v36 }
 0x1de   :  { %v301_v37 = vpop.eup %300 }
 0x1df   :  { %v254_v38 = vmul.f32 %v301_v37, %v247_v32 }
 0x1e1   :  { %255 = vst.msk [vmem:[#allocation8] sm:$0x3] %vm42_vm4, %v254_v38 }
 0x1e2   :  { %353 = shalt.err (!%p350_p0)
}
 0x1e3   :  { %265 = dma.vmem_to_hbm [thread:$0]  %s263_s1, 32, %s409_s2, [#allocation5]  }
 0x1e4   :  { %366 = dma.done.wait [#allocation5], 32  }
 0x1e5   :  { %367 = vsyncadd [#allocation5], 4294967264 }
 0x1e6   :  { %269 = vsyncpa [#allocation4], 1 }
 0x1e7   :  { %270 = vsyncpa [#allocation7], 1 }
 0x1e8   :  { %271 = vsyncpa [#allocation5], 1 }

</bundles_post_ra>
